<compile_context>
chip_gen: v6e
topology: v6e:2x2x1
jax: 0.10.0
libtpu: 0.0.40
codegen_flags: <defaults>
</compile_context>

<pallas_src>
import jax
import jax.numpy as jnp
from jax.experimental import pallas as pl
from jax.experimental.pallas import tpu as pltpu

IN_FEATURES = 12 * 12   # 144
HIDDEN = 32
OUT_FEATURES = 10
OUT_PADDED = 128        # lane-dense output width (logits in cols 0..9)
MAX_TB = 512            # max batch-tile rows (multiple of 8, fills MXU M dim)


def _round_up(n, m):
    return ((n + m - 1) // m) * m


def mlp_kernel(x_ref, w1_ref, b1_ref, w2_ref, b2_ref, o_ref):
    # x_ref: (TB, 144), w1_ref: (144, 32), b1_ref: (1, 32),
    # w2_ref: (32, 128) (zero-padded beyond column 9), b2_ref: (1, 128),
    # o_ref: (TB, 128) lane-dense padded logits.
    x = x_ref[...]
    # Linear(144 -> 32) + ReLU  (MXU matmul, f32 accumulation)
    h = jnp.dot(x, w1_ref[...], preferred_element_type=jnp.float32) + b1_ref[...]
    h = jnp.maximum(h, 0.0)
    # Linear(32 -> 128-padded); columns 10..127 are exactly zero by construction.
    logits = jnp.dot(h, w2_ref[...], preferred_element_type=jnp.float32) + b2_ref[...]
    o_ref[...] = logits.astype(o_ref.dtype)


def neural_network_forward(x, w1, b1, w2, b2):
    """Pallas-backed forward pass of the PyTorch NeuralNetwork module.

    x: (B, 1, 12, 12) or (B, 12, 12) or (B, 144) float32.
    w1: (144, 32), b1: (32,), w2: (32, 10), b2: (10,)  (weights already
    transposed to "input-major" layout, i.e. torch's weight.T).
    """
    B = x.shape[0]
    x_flat = x.reshape(B, -1).astype(jnp.float32)
    assert x_flat.shape[1] == IN_FEATURES

    # Pad the output projection to 128 lanes so the kernel's store is an
    # unmasked, lane-dense vst (largest single measured lever); the extra
    # columns are mathematically zero and sliced off below.
    w2_p = jnp.zeros((HIDDEN, OUT_PADDED), jnp.float32).at[:, :OUT_FEATURES].set(
        w2.astype(jnp.float32))
    b2_p = jnp.zeros((1, OUT_PADDED), jnp.float32).at[0, :OUT_FEATURES].set(
        b2.astype(jnp.float32))
    b1_2d = b1.reshape(1, HIDDEN).astype(jnp.float32)
    w1 = w1.astype(jnp.float32)
    # TODO(synk): optionally cast x_flat/w1 to bfloat16 here to halve HBM input
    # traffic when the accuracy budget allows (accumulation stays f32).

    # Batch tile: big enough to amortize per-step overhead and fill the MXU M
    # dimension; tiny test batches get a single (padded) step. Per-step VMEM
    # (double-buffered): ~2*TB*(144+128)*4 B ≈ 1.1 MiB at TB=512 — far under
    # the 32 MiB scoped / 64 MiB (v7x) physical VMEM ceilings.
    tb = min(MAX_TB, _round_up(B, 8))
    grid = (pl.cdiv(B, tb),)

    out_padded = pl.pallas_call(
        mlp_kernel,
        out_shape=jax.ShapeDtypeStruct((B, OUT_PADDED), jnp.float32),
        grid=grid,
        in_specs=[
            pl.BlockSpec((tb, IN_FEATURES), lambda i: (i, 0)),       # x: tiled over batch
            pl.BlockSpec((IN_FEATURES, HIDDEN), lambda i: (0, 0)),   # w1: resident
            pl.BlockSpec((1, HIDDEN), lambda i: (0, 0)),             # b1: resident
            pl.BlockSpec((HIDDEN, OUT_PADDED), lambda i: (0, 0)),    # w2 (padded): resident
            pl.BlockSpec((1, OUT_PADDED), lambda i: (0, 0)),         # b2 (padded): resident
        ],
        out_specs=pl.BlockSpec((tb, OUT_PADDED), lambda i: (i, 0)),
        compiler_params=pltpu.CompilerParams(
            dimension_semantics=("parallel",),          # shards batch across TCs on v7x
            vmem_limit_bytes=32 * 1024 * 1024,
        ),
    )(x_flat, w1, b1_2d, w2_p, b2_p)

    return out_padded[:, :OUT_FEATURES]


def init_params(key):
    """Deterministic parameter init mimicking nn.Linear shapes.

    Returns weights already transposed to (in, out) layout so the kernel does
    x @ W + b, matching torch's x @ weight.T + bias.
    """
    k1, k2, k3, k4 = jax.random.split(key, 4)
    bound1 = 1.0 / (IN_FEATURES ** 0.5)
    bound2 = 1.0 / (HIDDEN ** 0.5)
    w1 = jax.random.uniform(k1, (IN_FEATURES, HIDDEN), jnp.float32, -bound1, bound1)
    b1 = jax.random.uniform(k2, (HIDDEN,), jnp.float32, -bound1, bound1)
    w2 = jax.random.uniform(k3, (HIDDEN, OUT_FEATURES), jnp.float32, -bound2, bound2)
    b2 = jax.random.uniform(k4, (OUT_FEATURES,), jnp.float32, -bound2, bound2)
    return w1, b1, w2, b2


def reference_forward(x, w1, b1, w2, b2):
    x_flat = x.reshape(x.shape[0], -1)
    h = jnp.maximum(x_flat @ w1 + b1, 0.0)
    return h @ w2 + b2


if __name__ == "__main__":
    key = jax.random.PRNGKey(0)
    kx, kp = jax.random.split(key)

    B = 2
    x = jax.random.normal(kx, (B, 1, 12, 12), dtype=jnp.float32)
    w1, b1, w2, b2 = init_params(kp)

    logits = neural_network_forward(x, w1, b1, w2, b2)
    logits = jax.block_until_ready(logits)

    ref = reference_forward(x, w1, b1, w2, b2)
    assert logits.shape == (B, OUT_FEATURES)
    assert jnp.allclose(logits, ref, atol=1e-4, rtol=1e-4)

    print("KERNEL_OK")
</pallas_src>

<mosaic_0001>
module attributes {stable_mosaic.version = 11 : i64} {
  func.func @mlp_kernel(%arg0: i32, %arg1: memref<8x144xf32, #tpu.memory_space<vmem>>, %arg2: memref<144x32xf32, #tpu.memory_space<vmem>>, %arg3: memref<1x32xf32, #tpu.memory_space<vmem>>, %arg4: memref<32x128xf32, #tpu.memory_space<vmem>>, %arg5: memref<1x128xf32, #tpu.memory_space<vmem>>, %arg6: memref<8x128xf32, #tpu.memory_space<vmem>>) attributes {dimension_semantics = [#tpu.dimension_semantics<parallel>], iteration_bounds = array<i64: 1>, scalar_prefetch = 0 : i64, scratch_operands = 0 : i64, tpu.core_type = #tpu.core_type<tc>, window_params = [{transform_indices = @transform_0, window_bounds = array<i64: 8, 144>}, {pipeline_mode = #tpu.pipeline_mode<synchronous>, transform_indices = @transform_1, window_bounds = array<i64: 144, 32>}, {pipeline_mode = #tpu.pipeline_mode<synchronous>, transform_indices = @transform_2, window_bounds = array<i64: 1, 32>}, {pipeline_mode = #tpu.pipeline_mode<synchronous>, transform_indices = @transform_3, window_bounds = array<i64: 32, 128>}, {pipeline_mode = #tpu.pipeline_mode<synchronous>, transform_indices = @transform_4, window_bounds = array<i64: 1, 128>}, {transform_indices = @transform_5, window_bounds = array<i64: 8, 128>}]} {
    %c0 = arith.constant 0 : index
    %c0_0 = arith.constant 0 : index
    %0 = vector.load %arg1[%c0, %c0_0] : memref<8x144xf32, #tpu.memory_space<vmem>>, vector<8x144xf32>
    %c0_1 = arith.constant 0 : index
    %c0_2 = arith.constant 0 : index
    %1 = vector.load %arg2[%c0_1, %c0_2] : memref<144x32xf32, #tpu.memory_space<vmem>>, vector<144x32xf32>
    %cst = arith.constant dense<0.000000e+00> : vector<8x32xf32>
    %2 = tpu.matmul %0, %1, %cst {dimension_numbers = #tpu.dot_dimension_numbers<[1], [0], [0], [1], [0, 0, 1, 1], [], []>} : vector<8x144xf32>, vector<144x32xf32>, vector<8x32xf32> -> vector<8x32xf32>
    %c0_3 = arith.constant 0 : index
    %c0_4 = arith.constant 0 : index
    %3 = vector.load %arg3[%c0_3, %c0_4] : memref<1x32xf32, #tpu.memory_space<vmem>>, vector<1x32xf32>
    %4 = vector.broadcast %3 : vector<1x32xf32> to vector<8x32xf32>
    %5 = arith.addf %2, %4 : vector<8x32xf32>
    %cst_5 = arith.constant 0.000000e+00 : f32
    %6 = vector.broadcast %cst_5 : f32 to vector<8x32xf32>
    %7 = arith.maximumf %5, %6 : vector<8x32xf32>
    %c0_6 = arith.constant 0 : index
    %c0_7 = arith.constant 0 : index
    %8 = vector.load %arg4[%c0_6, %c0_7] : memref<32x128xf32, #tpu.memory_space<vmem>>, vector<32x128xf32>
    %cst_8 = arith.constant dense<0.000000e+00> : vector<8x128xf32>
    %9 = tpu.matmul %7, %8, %cst_8 {dimension_numbers = #tpu.dot_dimension_numbers<[1], [0], [0], [1], [0, 0, 1, 1], [], []>} : vector<8x32xf32>, vector<32x128xf32>, vector<8x128xf32> -> vector<8x128xf32>
    %c0_9 = arith.constant 0 : index
    %c0_10 = arith.constant 0 : index
    %10 = vector.load %arg5[%c0_9, %c0_10] : memref<1x128xf32, #tpu.memory_space<vmem>>, vector<1x128xf32>
    %11 = vector.broadcast %10 : vector<1x128xf32> to vector<8x128xf32>
    %12 = arith.addf %9, %11 : vector<8x128xf32>
    %c0_11 = arith.constant 0 : index
    %c0_12 = arith.constant 0 : index
    %13 = vector.load %arg6[%c0_11, %c0_12] : memref<8x128xf32, #tpu.memory_space<vmem>>, vector<8x128xf32>
    tpu.vector_store %arg6[%c0_11, %c0_12], %12 {strides = array<i32>} : memref<8x128xf32, #tpu.memory_space<vmem>>, vector<8x128xf32>,
    return
  }
  func.func @transform_0(%arg0: i32) -> (i32, i32) {
    %c0_i32 = arith.constant 0 : i32
    %c0_i32_0 = arith.constant 0 : i32
    return %arg0, %c0_i32 : i32, i32
  }
  func.func @transform_1(%arg0: i32) -> (i32, i32) {
    %c0_i32 = arith.constant 0 : i32
    %c0_i32_0 = arith.constant 0 : i32
    %c0_i32_1 = arith.constant 0 : i32
    return %c0_i32, %c0_i32_0 : i32, i32
  }
  func.func @transform_2(%arg0: i32) -> (i32, i32) {
    %c0_i32 = arith.constant 0 : i32
    %c0_i32_0 = arith.constant 0 : i32
    %c0_i32_1 = arith.constant 0 : i32
    return %c0_i32, %c0_i32_0 : i32, i32
  }
  func.func @transform_3(%arg0: i32) -> (i32, i32) {
    %c0_i32 = arith.constant 0 : i32
    %c0_i32_0 = arith.constant 0 : i32
    %c0_i32_1 = arith.constant 0 : i32
    return %c0_i32, %c0_i32_0 : i32, i32
  }
  func.func @transform_4(%arg0: i32) -> (i32, i32) {
    %c0_i32 = arith.constant 0 : i32
    %c0_i32_0 = arith.constant 0 : i32
    %c0_i32_1 = arith.constant 0 : i32
    return %c0_i32, %c0_i32_0 : i32, i32
  }
  func.func @transform_5(%arg0: i32) -> (i32, i32) {
    %c0_i32 = arith.constant 0 : i32
    %c0_i32_0 = arith.constant 0 : i32
    return %arg0, %c0_i32 : i32, i32
  }
}

</mosaic_0001>

<bundles_post_ra>
// kernel: tpu_custom_call.1
= control target key start
LH: loop header
LB: loop body
LE: loop exit
PB: predicated region body
PF: predicated region fallthrough
CT: control target
= control target key end

     0   :  { %10 = vsyncpa [#allocation3], 0  ;;  %v301_v1 = vmov 0.0   ;;  %vm73_vm0 = vcmask 130048   ;;  %vm302_vm1 = vmmov 0   ;;  %vm158_vm2 = vcmask 261120   ;;  %s440_s0 = inlined_call_operand.vmem [shape: f32[2,144], index: 0, kind: input, shape index: {}]   ;;  %s441_s1 = inlined_call_operand.vmem [shape: f32[144,32], index: 1, kind: input, shape index: {}]   ;;  %s442_s2 = inlined_call_operand.vmem [shape: f32[1,32], index: 2, kind: input, shape index: {}]   ;;  %s443_s3 = inlined_call_operand.vmem [shape: f32[32,128], index: 3, kind: input, shape index: {}]   ;;  %s444_s4 = inlined_call_operand.vmem [shape: f32[1,128], index: 4, kind: input, shape index: {}]   ;;  %s445_s5 = inlined_call_operand.hbm [shape: f32[2,128], index: 5, kind: output, shape index: {}]  }
   0x1   :  { %v40_v0 = vld [vmem:[%s441_s1 + $0x78] sm:$0xff]  ;;  %76 = vmatprep.subr.mxu0 %v301_v1  ;;  %v39_v2 = vld [vmem:[%s441_s1 + $0x70] sm:$0xff]  ;;  %258 = vmatprep.subr.mxu1 %v301_v1  ;;  %v38_v3 = vld [vmem:[%s441_s1 + $0x68] sm:$0xff] }
   0x2   :  { %77 = vmatpush1.msra.mxu0 %v40_v0  ;;  %v37_v4 = vld [vmem:[%s441_s1 + $0x60] sm:$0xff]  ;;  %v36_v5 = vld [vmem:[%s441_s1 + $0x58] sm:$0xff]  ;;  %v278_v7 = vld.sshfl [vmem:[%s440_s0 + $0x8] sm:$0xff pattern:$0x76325410]  ;;  %266 = vmatprep.mubr.msk.f32.mxu1 %vm302_vm1, %v301_v1 }
   0x3   :  { %78 = vmatprep.subr.mxu0 %v301_v1  ;;  %v277_v6 = vld.sshfl [vmem:[%s440_s0] sm:$0xff pattern:$0x76325410]  ;;  %v150_v8 = vld [vmem:[%s443_s3 + $0x18] sm:$0xff]  ;;  %v35_v9 = vld [vmem:[%s441_s1 + $0x50] sm:$0xff] }
   0x4   :  { %79 = vmatpush1.msra.mxu0 %v39_v2  ;;  %259 = vmatpush3.msra.mxu1 %v150_v8  ;;  %v34_v10 = vld [vmem:[%s441_s1 + $0x48] sm:$0xff]  ;;  %v71_v11 = vcombine.high %v277_v6, %v278_v7  ;;  %v33_v12 = vld [vmem:[%s441_s1 + $0x40] sm:$0xff]  ;;  %v32_v13 = vld [vmem:[%s441_s1 + $0x38] sm:$0xff]  ;;  %v70_v23 = vcombine.low %v277_v6, %v278_v7 }
   0x5   :  { %80 = vmatprep.subr.mxu0 %v301_v1  ;;  %260 = vmatprep.subr.mxu1 %v301_v1  ;;  %v31_v14 = vld [vmem:[%s441_s1 + $0x30] sm:$0xff]  ;;  %v30_v15 = vld [vmem:[%s441_s1 + $0x28] sm:$0xff]  ;;  %v29_v16 = vld [vmem:[%s441_s1 + $0x20] sm:$0xff] }
   0x6   :  { %81 = vmatpush1.msra.mxu0 %v38_v3  ;;  %250 = vmatprep.mubr.msk.f32.mxu0 %vm73_vm0, %v71_v11  ;;  %v28_v17 = vld [vmem:[%s441_s1 + $0x18] sm:$0xff]  ;;  %v27_v18 = vld [vmem:[%s441_s1 + $0x10] sm:$0xff]  ;;  %v26_v19 = vld [vmem:[%s441_s1 + $0x8] sm:$0xff] }
   0x7   :  { %82 = vmatprep.subr.mxu0 %v301_v1  ;;  %v25_v20 = vld [vmem:[%s441_s1] sm:$0xff]  ;;  %v42_v21 = vld [vmem:[%s441_s1 + $0x88] sm:$0xff]  ;;  %v149_v24 = vld [vmem:[%s443_s3 + $0x10] sm:$0xff] }
   0x8   :  { %83 = vmatpush1.msra.mxu0 %v37_v4  ;;  %v41_v22 = vld [vmem:[%s441_s1 + $0x80] sm:$0xff]  ;;  %261 = vmatpush3.msra.mxu1 %v149_v24  ;;  %v148_v25 = vld [vmem:[%s443_s3 + $0x8] sm:$0xff] }
   0x9   :  { %84 = vmatprep.subr.mxu0 %v301_v1  ;;  %262 = vmatprep.subr.mxu1 %v301_v1  ;;  %v147_v26 = vld [vmem:[%s443_s3] sm:$0xff] }
   0xa   :  { %85 = vmatpush1.msra.mxu0 %v36_v5  ;;  %263 = vmatpush3.msra.mxu1 %v148_v25  ;;  %v249_v27 = vld [vmem:[%s442_s2] ss:$0 sm:$0xff] }
   0xb   :  { %86 = vmatprep.subr.mxu0 %v301_v1  ;;  %264 = vmatprep.subr.mxu1 %v301_v1  ;;  %v251_v32 = vld [vmem:[%s444_s4] ss:$0 sm:$0xff] }
   0xc   :  { %87 = vmatpush1.msra.mxu0 %v35_v9  ;;  %265 = vmatpush3.msra.mxu1 %v147_v26 }
   0xd   :  { %88 = vmatprep.subr.mxu0 %v301_v1 }
   0xe   :  { %89 = vmatpush1.msra.mxu0 %v34_v10 }
   0xf   :  { %90 = vmatprep.subr.mxu0 %v301_v1 }
  0x10   :  { %91 = vmatpush1.msra.mxu0 %v33_v12 }
  0x11   :  { %92 = vmatprep.subr.mxu0 %v301_v1 }
  0x12   :  { %93 = vmatpush1.msra.mxu0 %v32_v13 }
  0x13   :  { %94 = vmatprep.subr.mxu0 %v301_v1 }
  0x14   :  { %95 = vmatpush1.msra.mxu0 %v31_v14 }
  0x15   :  { %96 = vmatprep.subr.mxu0 %v301_v1 }
  0x16   :  { %97 = vmatpush1.msra.mxu0 %v30_v15 }
  0x17   :  { %98 = vmatprep.subr.mxu0 %v301_v1 }
  0x18   :  { %99 = vmatpush1.msra.mxu0 %v29_v16 }
  0x19   :  { %100 = vmatprep.subr.mxu0 %v301_v1 }
  0x1a   :  { %101 = vmatpush1.msra.mxu0 %v28_v17 }
  0x1b   :  { %102 = vmatprep.subr.mxu0 %v301_v1 }
  0x1c   :  { %103 = vmatpush1.msra.mxu0 %v27_v18 }
  0x1d   :  { %104 = vmatprep.subr.mxu0 %v301_v1 }
  0x1e   :  { %105 = vmatpush1.msra.mxu0 %v26_v19 }
  0x1f   :  { %106 = vmatprep.subr.mxu0 %v301_v1 }
  0x20   :  { %107 = vmatpush1.msra.mxu0 %v25_v20 }
  0x21   :  { %136 = vmatprep.subr.mxu0 %v301_v1 }
  0x22   :  { %137 = vmatpush2.msra.mxu0 %v42_v21 }
  0x23   :  { %138 = vmatprep.subr.mxu0 %v301_v1 }
  0x24   :  { %139 = vmatpush2.msra.mxu0 %v41_v22 }
  0x25   :  { %141 = vmatmul.mubr.f32.vlgmr.msra.gmra.mxu0 %v70_v23 }
  0xe5   :  { %v142_v28 = vpop.f32.mrf.mxu0 }
  0xe6   :  { %v143_v29 = vadd.f32 %v249_v27, %v142_v28 }
  0xe7   :  { %v144_v30 = vpop.f32.mrf.mxu0 }
  0xe8   :  { %v146_v31 = vmax.f32 %v143_v29, 0.0 }
  0xea   :  { %267 = vmatmul.mubr.msk.f32.vlgmr.msra.gmra.mxu1 %vm158_vm2, %v146_v31 }
 0x1aa   :  { %v228_v33 = vpop.f32.mrf.mxu1 }
 0x1ab   :  { %v229_v34 = vadd.f32 %v251_v32, %v228_v33 }
 0x1ac   :  { %v268_v35 = vpop.f32.mrf.mxu1 }
 0x1ad   :  { %232 = vst [vmem:[#allocation2] sm:$0xff] %v229_v34 }
 0x1ae   :  { %237 = vsyncadd [#allocation3], 96  ;;  %s303_s3 = smov [#allocation2]  }
 0x1af   :  { %s238_s17 = sshll.u32 %s303_s3, 4  ;;  %s239_s17 = int_to_ptr.vmem [resolvable:$true] %s238_s17 }
 0x1b0   :  { %s279_s18 = scalar_lea.vmem %s239_s17, 32  ;;  %s283_s2 = scalar_lea.vmem %s239_s17, 128 }
 0x1b1   :  { %p280_p0 = scmp.ne.s32.totalorder %s239_s17, %s279_s18  ;;  %p284_p1 = scmp.lt.s32.totalorder %s239_s17, %s239_s17 }
 0x1b2   :  { %p285_p2 = scmp.lt.s32.totalorder %s283_s2, %s279_s18 }
 0x1b4   :  { %p286_p3 = por %p285_p2, %p284_p1 }
 0x1b6   :  { %p287_p4 = pnand %p286_p3, %p280_p0 }
 0x1b8   :  { %290 = shalt.err (!%p287_p4)
}
 0x1b9   :  { %s304_s19 = smov 32   ;;  %s305_s20 = smov 2  }
 0x1ba   :  { %244 = dma.vmem_to_hbm [thread:$0]  %s239_s17, 32, %s445_s5, [#allocation3], %s304_s19, %s304_s19, %s305_s20  }
 0x1bb   :  { %299 = dma.done.wait [#allocation3], 128  }
 0x1bc   :  { %300 = vsyncadd [#allocation3], 4294967168 }
 0x1bd   :  { %248 = vsyncpa [#allocation3], 1 }

</bundles_post_ra>
